<compile_context>
chip_gen: v5e
topology: v5e:2x2
jax: 0.10.0
libtpu: 0.0.40
codegen_flags: <defaults>
</compile_context>

<pallas_src>
import jax
import jax.numpy as jnp
from jax.experimental import pallas as pl
from jax.experimental.pallas import tpu as pltpu


def _fuse_kernel(w_ref, x1_ref, x2_ref, x3_ref, o_ref):
    # w_ref : (3,) f32 softmax weights in SMEM (scalar reads, no per-step DMA)
    # xK_ref: (tm, hw_tile) VMEM tile of flattened UNet-K output
    w0 = w_ref[0]
    w1 = w_ref[1]
    w2 = w_ref[2]
    acc = x1_ref[...].astype(jnp.float32) * w0
    acc = acc + x2_ref[...].astype(jnp.float32) * w1
    acc = acc + x3_ref[...].astype(jnp.float32) * w2
    o_ref[...] = acc.astype(o_ref.dtype)


# ~1 MiB per stream block -> (3 inputs + 1 output) x 2 buffers ~= 8 MiB VMEM.
_MAX_BLOCK_BYTES = 1 << 20


def _largest_multiple_divisor(n, base, cap):
    """Largest multiple of `base` that divides `n` and is <= cap, else None."""
    best = None
    for d in range(base, min(n, cap) + 1, base):
        if n % d == 0:
            best = d
    return best


@jax.jit
def im_seg_2_forward(a, out1, out2, out3):
    """a: (3,) mixing logits; outK: (B, C, H, W) outputs of the three UNet16s."""
    B, C, H, W = out1.shape
    rows = B * C
    HW = H * W
    assert a.shape == (3,), f"a must be (3,), got {a.shape}"

    # Hoist the softmax out of the kernel: 3 scalars, computed once.
    w = jax.nn.softmax(a.astype(jnp.float32), axis=0)

    x1 = out1.reshape(rows, HW)
    x2 = out2.reshape(rows, HW)
    x3 = out3.reshape(rows, HW)

    itemsize = jnp.dtype(out1.dtype).itemsize

    # Lane (last-dim) tile: largest multiple of 128 dividing HW under budget;
    # fall back to the full extent (always legal) if none exists.
    hw_cap = max(128, _MAX_BLOCK_BYTES // (8 * itemsize))
    hw_tile = _largest_multiple_divisor(HW, 128, hw_cap)
    if hw_tile is None:
        hw_tile = HW

    # Sublane (row) tile: largest multiple of 8 dividing rows under budget;
    # fall back to the full extent (handles rows not divisible by 8).
    tm_cap = max(8, _MAX_BLOCK_BYTES // (hw_tile * itemsize))
    tm = _largest_multiple_divisor(rows, 8, tm_cap)
    if tm is None:
        tm = rows

    grid = (rows // tm, HW // hw_tile)

    fused = pl.pallas_call(
        _fuse_kernel,
        out_shape=jax.ShapeDtypeStruct((rows, HW), out1.dtype),
        grid=grid,
        in_specs=[
            # Softmax weights live in SMEM for the whole kernel (no re-read
            # per grid step).
            pl.BlockSpec(memory_space=pltpu.MemorySpace.SMEM),
            pl.BlockSpec((tm, hw_tile), lambda i, j: (i, j)),
            pl.BlockSpec((tm, hw_tile), lambda i, j: (i, j)),
            pl.BlockSpec((tm, hw_tile), lambda i, j: (i, j)),
        ],
        out_specs=pl.BlockSpec((tm, hw_tile), lambda i, j: (i, j)),
        compiler_params=pltpu.CompilerParams(
            dimension_semantics=("parallel", "parallel"),
            vmem_limit_bytes=48 * 1024 * 1024,
        ),
    )(w, x1, x2, x3)

    return fused.reshape(B, C, H, W)


def _reference(a, out1, out2, out3):
    w = jax.nn.softmax(a.astype(jnp.float32), axis=0)
    return (w[0] * out1.astype(jnp.float32)
            + w[1] * out2.astype(jnp.float32)
            + w[2] * out3.astype(jnp.float32)).astype(out1.dtype)


if __name__ == "__main__":
    # Small shapes consistent with the module: three UNet16 outputs (B,C,H,W);
    # parameter a initialized to [0.6, 0.2, 0.2] as in the PyTorch module.
    B, C, H, W = 2, 4, 16, 16

    key = jax.random.PRNGKey(0)
    k1, k2, k3 = jax.random.split(key, 3)

    a = jnp.array([0.6, 0.2, 0.2], dtype=jnp.float32)
    out1 = jax.random.normal(k1, (B, C, H, W), dtype=jnp.float32)
    out2 = jax.random.normal(k2, (B, C, H, W), dtype=jnp.float32)
    out3 = jax.random.normal(k3, (B, C, H, W), dtype=jnp.float32)

    result = jax.block_until_ready(im_seg_2_forward(a, out1, out2, out3))
    ref = _reference(a, out1, out2, out3)
    assert result.shape == (B, C, H, W)
    assert jnp.allclose(result, ref, atol=1e-5, rtol=1e-5)

    # Extra robustness check: rows not divisible by 8, HW not a multiple of
    # 128 (exercises the full-extent fallback tiles).
    B2, C2, H2, W2 = 1, 3, 10, 10
    o1 = jax.random.normal(k1, (B2, C2, H2, W2), dtype=jnp.float32)
    o2 = jax.random.normal(k2, (B2, C2, H2, W2), dtype=jnp.float32)
    o3 = jax.random.normal(k3, (B2, C2, H2, W2), dtype=jnp.float32)
    r2 = jax.block_until_ready(im_seg_2_forward(a, o1, o2, o3))
    assert jnp.allclose(r2, _reference(a, o1, o2, o3), atol=1e-5, rtol=1e-5)

    print("KERNEL_OK")
</pallas_src>

<mosaic_0001>
module attributes {stable_mosaic.version = 11 : i64} {
  func.func @_fuse_kernel(%arg0: i32, %arg1: i32, %arg2: memref<3xf32, #tpu.memory_space<smem>>, %arg3: memref<8x256xf32, #tpu.memory_space<vmem>>, %arg4: memref<8x256xf32, #tpu.memory_space<vmem>>, %arg5: memref<8x256xf32, #tpu.memory_space<vmem>>, %arg6: memref<8x256xf32, #tpu.memory_space<vmem>>) attributes {dimension_semantics = [#tpu.dimension_semantics<parallel>, #tpu.dimension_semantics<parallel>], iteration_bounds = array<i64: 1, 1>, scalar_prefetch = 0 : i64, scratch_operands = 0 : i64, tpu.core_type = #tpu.core_type<tc>, window_params = [{transform_indices = @transform_0, window_bounds = array<i64: 3>}, {transform_indices = @transform_1, window_bounds = array<i64: 8, 256>}, {transform_indices = @transform_2, window_bounds = array<i64: 8, 256>}, {transform_indices = @transform_3, window_bounds = array<i64: 8, 256>}, {transform_indices = @transform_4, window_bounds = array<i64: 8, 256>}]} {
    %c0 = arith.constant 0 : index
    %0 = memref.load %arg2[%c0] : memref<3xf32, #tpu.memory_space<smem>>
    %c1 = arith.constant 1 : index
    %1 = memref.load %arg2[%c1] : memref<3xf32, #tpu.memory_space<smem>>
    %c2 = arith.constant 2 : index
    %2 = memref.load %arg2[%c2] : memref<3xf32, #tpu.memory_space<smem>>
    %c0_0 = arith.constant 0 : index
    %c0_1 = arith.constant 0 : index
    %3 = vector.load %arg3[%c0_0, %c0_1] : memref<8x256xf32, #tpu.memory_space<vmem>>, vector<8x256xf32>
    %4 = vector.broadcast %0 : f32 to vector<8x256xf32>
    %5 = arith.mulf %3, %4 : vector<8x256xf32>
    %c0_2 = arith.constant 0 : index
    %c0_3 = arith.constant 0 : index
    %6 = vector.load %arg4[%c0_2, %c0_3] : memref<8x256xf32, #tpu.memory_space<vmem>>, vector<8x256xf32>
    %7 = vector.broadcast %1 : f32 to vector<8x256xf32>
    %8 = arith.mulf %6, %7 : vector<8x256xf32>
    %9 = arith.addf %5, %8 : vector<8x256xf32>
    %c0_4 = arith.constant 0 : index
    %c0_5 = arith.constant 0 : index
    %10 = vector.load %arg5[%c0_4, %c0_5] : memref<8x256xf32, #tpu.memory_space<vmem>>, vector<8x256xf32>
    %11 = vector.broadcast %2 : f32 to vector<8x256xf32>
    %12 = arith.mulf %10, %11 : vector<8x256xf32>
    %13 = arith.addf %9, %12 : vector<8x256xf32>
    %c0_6 = arith.constant 0 : index
    %c0_7 = arith.constant 0 : index
    %14 = vector.load %arg6[%c0_6, %c0_7] : memref<8x256xf32, #tpu.memory_space<vmem>>, vector<8x256xf32>
    tpu.vector_store %arg6[%c0_6, %c0_7], %13 {strides = array<i32>} : memref<8x256xf32, #tpu.memory_space<vmem>>, vector<8x256xf32>,
    return
  }
  func.func @transform_0(%arg0: i32, %arg1: i32) -> i32 {
    %c0_i32 = arith.constant 0 : i32
    %c0_i32_0 = arith.constant 0 : i32
    return %c0_i32 : i32
  }
  func.func @transform_1(%arg0: i32, %arg1: i32) -> (i32, i32) {
    %c0_i32 = arith.constant 0 : i32
    return %arg0, %arg1 : i32, i32
  }
  func.func @transform_2(%arg0: i32, %arg1: i32) -> (i32, i32) {
    %c0_i32 = arith.constant 0 : i32
    return %arg0, %arg1 : i32, i32
  }
  func.func @transform_3(%arg0: i32, %arg1: i32) -> (i32, i32) {
    %c0_i32 = arith.constant 0 : i32
    return %arg0, %arg1 : i32, i32
  }
  func.func @transform_4(%arg0: i32, %arg1: i32) -> (i32, i32) {
    %c0_i32 = arith.constant 0 : i32
    return %arg0, %arg1 : i32, i32
  }
}

</mosaic_0001>

<bundles_post_ra>
// kernel: im_seg_2_forward.1
= control target key start
LH: loop header
LB: loop body
LE: loop exit
PB: predicated region body
PF: predicated region fallthrough
CT: control target
= control target key end

     0   :  { %9 = vsyncpa [#allocation3], 0  ;;  %s76_s18 = smov [#allocation2]   ;;  %s129_s0 = inlined_call_operand.vmem [shape: f32[3], index: 0, kind: input, shape index: {}]   ;;  %s130_s1 = inlined_call_operand.vmem [shape: f32[8,256], index: 1, kind: input, shape index: {}]   ;;  %s131_s2 = inlined_call_operand.vmem [shape: f32[8,256], index: 2, kind: input, shape index: {}]   ;;  %s132_s3 = inlined_call_operand.vmem [shape: f32[8,256], index: 3, kind: input, shape index: {}]   ;;  %s133_s4 = inlined_call_operand.vmem [shape: f32[8,256], index: 4, kind: output, shape index: {}]  }
   0x1   :  { %s15_s17 = sshll.u32 %s129_s0, 4  ;;  %s16_s17 = int_to_ptr.vmem [resolvable:$true] %s15_s17 }
   0x2   :  { %18 = dma.vmem_to_smem %s16_s17, 16, %s76_s18, [#allocation3]  }
   0x3   :  { %74 = dma.done.wait [#allocation3], 16  }
   0x4   :  { %75 = vsyncadd [#allocation3], 4294967280 }
   0x5   :  { %29 = sfence }
   0x6   :  { %s30_s19 = sld [smem:[#allocation2]]  ;;  %v33_v0 = vld [vmem:[%s130_s1] sm:$0xff]  ;;  %v34_v1 = vld [vmem:[%s130_s1 + $0x8] sm:$0xff] }
   0x7   :  { %s59_s20 = sld [smem:[#allocation2 + $0x1]]  ;;  %v38_v2 = vld [vmem:[%s131_s2] sm:$0xff]  ;;  %v39_v3 = vld [vmem:[%s131_s2 + $0x8] sm:$0xff] }
   0x8   :  { %s60_s21 = sld [smem:[#allocation2 + $0x2]]  ;;  %v45_v5 = vld [vmem:[%s132_s3] sm:$0xff]  ;;  %v46_v6 = vld [vmem:[%s132_s3 + $0x8] sm:$0xff] }
   0xc   :  { %v35_v4 = vstv %s30_s19 }
   0xd   :  { %v36_v7 = vmul.f32 %v35_v4, %v33_v0  ;;  %v40_v8 = vstv %s59_s20  ;;  %v37_v9 = vmul.f32 %v35_v4, %v34_v1 }
   0xe   :  { %v41_v10 = vmul.f32 %v40_v8, %v38_v2  ;;  %v47_v11 = vstv %s60_s21  ;;  %v42_v12 = vmul.f32 %v40_v8, %v39_v3 }
   0xf   :  { %v48_v13 = vmul.f32 %v47_v11, %v45_v5  ;;  %v49_v14 = vmul.f32 %v47_v11, %v46_v6 }
  0x10   :  { %v43_v15 = vadd.f32 %v41_v10, %v36_v7  ;;  %v44_v16 = vadd.f32 %v42_v12, %v37_v9 }
  0x12   :  { %v50_v17 = vadd.f32 %v48_v13, %v43_v15  ;;  %v51_v18 = vadd.f32 %v49_v14, %v44_v16 }
  0x14   :  { %52 = vst [vmem:[%s133_s4] sm:$0xff] %v50_v17 }
  0x15   :  { %53 = vst [vmem:[%s133_s4 + $0x8] sm:$0xff] %v51_v18 }
  0x16   :  { %58 = vsyncpa [#allocation3], 1 }

</bundles_post_ra>
